<compile_context>
chip_gen: v7x
topology: tpu7x:2x2x1
jax: 0.10.0
libtpu: 0.0.40
codegen_flags: <defaults>
</compile_context>

<pallas_src>
import functools

import jax
import jax.numpy as jnp
from jax.experimental import pallas as pl
from jax.experimental.pallas import tpu as pltpu


# ---------------------------------------------------------------------------
# Hardware / budget helpers
# ---------------------------------------------------------------------------

def _vmem_capacity_bytes():
    """Physical VMEM per TensorCore; falls back to the smallest generation (v7x)."""
    try:
        cap = int(pltpu.get_tpu_info().vmem_capacity_bytes)
        if cap > 0:
            return cap
    except Exception:
        pass
    return 64 * 1024 * 1024


def _vmem_limits():
    cap = _vmem_capacity_bytes()
    # ~75% of physical: ~96 MiB on v5e/v6e, ~48 MiB on v7x.
    limit = min((cap * 3) // 4, 112 * 1024 * 1024)
    return cap, int(limit)


_MAX_BATCH_TILE = 8  # static per-image unroll bound inside the fused kernel


def _choose_batch_tile(batch, per_image_bytes, data_budget):
    """Largest divisor of `batch` (<= _MAX_BATCH_TILE) whose double-buffered
    input+output slabs fit the per-step data budget."""
    best = 1
    for bt in range(1, min(batch, _MAX_BATCH_TILE) + 1):
        if batch % bt == 0 and 4 * bt * per_image_bytes <= data_budget:
            best = bt
    return best


# ---------------------------------------------------------------------------
# Kernels
# ---------------------------------------------------------------------------

def _se_fused_kernel(inv_hw, x_ref, w1_ref, b1_ref, w2_ref, b2_ref, o_ref):
    """Single pass over a (Bt, C, HW) slab: GAP -> lin1 -> ReLU -> lin2 -> sigmoid
    -> channel gate.  Per-image math is statically unrolled (Bt is small)."""
    for b in range(x_ref.shape[0]):
        xb = x_ref[b]                                                   # (C, HW)
        # squeeze: GAP over the lane axis, accumulated in f32
        g = jnp.sum(xb.astype(jnp.float32), axis=-1, keepdims=True) * inv_hw   # (C, 1)
        # excitation MLP (tiny): f32 operands, f32 accumulation
        h = jnp.dot(w1_ref[...], g, preferred_element_type=jnp.float32) + b1_ref[...]
        h = jnp.maximum(h, 0.0)                                         # (mid, 1)
        s = jnp.dot(w2_ref[...], h, preferred_element_type=jnp.float32) + b2_ref[...]
        s = jax.nn.sigmoid(s)                                           # (C, 1)
        # excite: per-channel (sublane) gate broadcast across lanes, stored in x dtype
        o_ref[b] = xb * s.astype(xb.dtype)


def _se_gate_kernel(inv_hw, hw, hw_tile,
                    x_ref, w1_ref, b1_ref, w2_ref, b2_ref, gate_ref, acc_ref):
    """Two-pass fallback, pass 1: HW-tiled GAP accumulation + excitation MLP."""
    t = pl.program_id(1)

    @pl.when(t == 0)
    def _():
        acc_ref[...] = jnp.zeros_like(acc_ref)

    xb = x_ref[0].astype(jnp.float32)                                   # (C, hw_tile)
    if hw % hw_tile != 0:                                               # static check
        lane = jax.lax.broadcasted_iota(jnp.int32, xb.shape, 1)
        xb = jnp.where(t * hw_tile + lane < hw, xb, 0.0)
    acc_ref[...] += jnp.sum(xb, axis=-1, keepdims=True)                 # (C, 1)

    @pl.when(t == pl.num_programs(1) - 1)
    def _():
        g = acc_ref[...] * inv_hw
        h = jnp.maximum(
            jnp.dot(w1_ref[...], g, preferred_element_type=jnp.float32) + b1_ref[...],
            0.0)
        s = jax.nn.sigmoid(
            jnp.dot(w2_ref[...], h, preferred_element_type=jnp.float32) + b2_ref[...])
        gate_ref[0] = s                                                  # (C, 1)


def _se_scale_kernel(x_ref, gate_ref, o_ref):
    """Two-pass fallback, pass 2: apply the per-channel gate, HW-tiled."""
    xb = x_ref[0]                                                       # (C, hw_tile)
    o_ref[0] = xb * gate_ref[0].astype(xb.dtype)                        # (C, 1) gate


# ---------------------------------------------------------------------------
# Wrapper
# ---------------------------------------------------------------------------

def se_block(x, params, *, donate_x=False, vmem_data_budget=None):
    """SE_Block forward.  x: (B, C, H, W) -> (B, C, H, W), same dtype as x."""
    B, C, H, W = x.shape
    hw = H * W
    w1, b1, w2, b2 = params["w1"], params["b1"], params["w2"], params["b2"]
    mid = w1.shape[0]
    assert w1.shape == (mid, C) and w2.shape == (C, mid)
    assert b1.shape == (mid, 1) and b2.shape == (C, 1)

    itemsize = jnp.dtype(x.dtype).itemsize
    per_image_bytes = C * hw * itemsize
    _, vmem_limit = _vmem_limits()
    if vmem_data_budget is None:
        weight_bytes = 4 * (w1.size + b1.size + w2.size + b2.size)
        vmem_data_budget = max((vmem_limit * 4) // 5 - 2 * weight_bytes, 1)

    x3 = x.reshape(B, C, hw)               # pure metadata reshape; no HBM copy
    inv_hw = 1.0 / hw
    io_alias = {0: 0} if donate_x else {}

    # ---------------- fused single-pass path (slab fits VMEM) ----------------
    if 4 * per_image_bytes <= vmem_data_budget:
        bt = _choose_batch_tile(B, per_image_bytes, vmem_data_budget)
        out = pl.pallas_call(
            functools.partial(_se_fused_kernel, inv_hw),
            out_shape=jax.ShapeDtypeStruct((B, C, hw), x.dtype),
            grid_spec=pltpu.PrefetchScalarGridSpec(
                num_scalar_prefetch=0,
                grid=(B // bt,),
                in_specs=[
                    pl.BlockSpec((bt, C, hw), lambda b: (b, 0, 0)),
                    pl.BlockSpec((mid, C), lambda b: (0, 0)),
                    pl.BlockSpec((mid, 1), lambda b: (0, 0)),
                    pl.BlockSpec((C, mid), lambda b: (0, 0)),
                    pl.BlockSpec((C, 1), lambda b: (0, 0)),
                ],
                out_specs=pl.BlockSpec((bt, C, hw), lambda b: (b, 0, 0)),
            ),
            compiler_params=pltpu.CompilerParams(
                dimension_semantics=("parallel",),
                vmem_limit_bytes=vmem_limit),
            input_output_aliases=io_alias,
        )(x3, w1, b1, w2, b2)
        return out.reshape(B, C, H, W)

    # ---------------- two-pass HW-tiled fallback (slab > VMEM budget) --------
    max_tile = vmem_data_budget // max(1, 4 * C * itemsize)
    hw_tile = max(128, (max_tile // 128) * 128)
    hw_tile = min(hw_tile, pl.cdiv(hw, 128) * 128)
    n_t = pl.cdiv(hw, hw_tile)

    gate = pl.pallas_call(
        functools.partial(_se_gate_kernel, inv_hw, hw, hw_tile),
        out_shape=jax.ShapeDtypeStruct((B, C, 1), jnp.float32),
        grid_spec=pltpu.PrefetchScalarGridSpec(
            num_scalar_prefetch=0,
            grid=(B, n_t),
            in_specs=[
                pl.BlockSpec((1, C, hw_tile), lambda b, t: (b, 0, t)),
                pl.BlockSpec((mid, C), lambda b, t: (0, 0)),
                pl.BlockSpec((mid, 1), lambda b, t: (0, 0)),
                pl.BlockSpec((C, mid), lambda b, t: (0, 0)),
                pl.BlockSpec((C, 1), lambda b, t: (0, 0)),
            ],
            out_specs=pl.BlockSpec((1, C, 1), lambda b, t: (b, 0, 0)),
            scratch_shapes=[pltpu.VMEM((C, 1), jnp.float32)],
        ),
        compiler_params=pltpu.CompilerParams(
            dimension_semantics=("parallel", "arbitrary"),
            vmem_limit_bytes=vmem_limit),
    )(x3, w1, b1, w2, b2)

    out = pl.pallas_call(
        _se_scale_kernel,
        out_shape=jax.ShapeDtypeStruct((B, C, hw), x.dtype),
        grid_spec=pltpu.PrefetchScalarGridSpec(
            num_scalar_prefetch=0,
            grid=(B, n_t),
            in_specs=[
                pl.BlockSpec((1, C, hw_tile), lambda b, t: (b, 0, t)),
                pl.BlockSpec((1, C, 1), lambda b, t: (b, 0, 0)),
            ],
            out_specs=pl.BlockSpec((1, C, hw_tile), lambda b, t: (b, 0, t)),
        ),
        compiler_params=pltpu.CompilerParams(
            dimension_semantics=("parallel", "parallel"),
            vmem_limit_bytes=vmem_limit),
        input_output_aliases=io_alias,
    )(x3, gate)
    return out.reshape(B, C, H, W)


# ---------------------------------------------------------------------------
# Parameters & pure-JAX reference
# ---------------------------------------------------------------------------

def make_se_params(key, in_channel, ratio):
    """Deterministic synthetic parameters (PyTorch Linear layout: weight (out, in))."""
    mid = max(1, int(in_channel / ratio))
    k1, k2, k3, k4 = jax.random.split(key, 4)
    w1 = jax.random.normal(k1, (mid, in_channel), jnp.float32) * in_channel ** -0.5
    b1 = jax.random.normal(k2, (mid,), jnp.float32) * 0.05
    w2 = jax.random.normal(k3, (in_channel, mid), jnp.float32) * mid ** -0.5
    b2 = jax.random.normal(k4, (in_channel,), jnp.float32) * 0.05
    return dict(w1=w1, b1=b1.reshape(mid, 1), w2=w2, b2=b2.reshape(in_channel, 1))


def se_block_reference(x, params):
    """Pure-JAX reference (f32 math)."""
    xf = x.astype(jnp.float32)
    g = jnp.mean(xf, axis=(2, 3))                                       # (B, C)
    h = jnp.maximum(g @ params["w1"].T + params["b1"][:, 0], 0.0)
    s = jax.nn.sigmoid(h @ params["w2"].T + params["b2"][:, 0])
    return xf * s[:, :, None, None]


# ---------------------------------------------------------------------------
# Self-test
# ---------------------------------------------------------------------------

if __name__ == "__main__":
    key = jax.random.PRNGKey(0)

    def check(x, params, tol, **kw):
        ref = se_block_reference(x, params)          # compute before any donation
        out = jax.block_until_ready(se_block(x, params, **kw))
        assert out.shape == x.shape and out.dtype == x.dtype, (out.shape, out.dtype)
        out32 = out.astype(jnp.float32)
        assert bool(jnp.all(jnp.isfinite(out32)))
        err = float(jnp.max(jnp.abs(out32 - ref)))
        assert err < tol, err

    # 1) fused single-pass, whole batch per grid step, lane-aligned spatial dims
    p1 = make_se_params(jax.random.fold_in(key, 1), 64, 8)
    x1 = jax.random.normal(jax.random.fold_in(key, 2), (2, 64, 16, 16), jnp.float32)
    check(x1, p1, 2e-2)

    # 2) unaligned spatial (HW = 49 < 128): full-extent block, no HBM padding/slicing
    p2 = make_se_params(jax.random.fold_in(key, 3), 32, 4)
    x2 = jax.random.normal(jax.random.fold_in(key, 4), (2, 32, 7, 7), jnp.float32)
    check(x2, p2, 2e-2)

    # 3) bf16 activations end-to-end (half the HBM traffic)
    check(x1.astype(jnp.bfloat16), p1, 5e-2)

    # 4) in-place gating via input_output_aliases (donated input copy)
    check(x1 * 1.0, p1, 2e-2, donate_x=True)

    # 5) two-pass HW-tiled fallback, forced via a tiny per-step data budget
    check(x1, p1, 2e-2, vmem_data_budget=4 * 64 * 128 * 4)

    print("KERNEL_OK")
</pallas_src>

<mosaic_0001>
module attributes {stable_mosaic.version = 11 : i64} {
  func.func @_se_fused_kernel(%arg0: i32, %arg1: memref<2x64x256xf32, #tpu.memory_space<vmem>>, %arg2: memref<8x64xf32, #tpu.memory_space<vmem>>, %arg3: memref<8x1xf32, #tpu.memory_space<vmem>>, %arg4: memref<64x8xf32, #tpu.memory_space<vmem>>, %arg5: memref<64x1xf32, #tpu.memory_space<vmem>>, %arg6: memref<2x64x256xf32, #tpu.memory_space<vmem>>) attributes {dimension_semantics = [#tpu.dimension_semantics<parallel>], iteration_bounds = array<i64: 1>, scalar_prefetch = 0 : i64, scratch_operands = 0 : i64, tpu.core_type = #tpu.core_type<tc>, window_params = [{transform_indices = @transform_0, window_bounds = array<i64: 2, 64, 256>}, {pipeline_mode = #tpu.pipeline_mode<synchronous>, transform_indices = @transform_1, window_bounds = array<i64: 8, 64>}, {pipeline_mode = #tpu.pipeline_mode<synchronous>, transform_indices = @transform_2, window_bounds = array<i64: 8, 1>}, {pipeline_mode = #tpu.pipeline_mode<synchronous>, transform_indices = @transform_3, window_bounds = array<i64: 64, 8>}, {pipeline_mode = #tpu.pipeline_mode<synchronous>, transform_indices = @transform_4, window_bounds = array<i64: 64, 1>}, {transform_indices = @transform_5, window_bounds = array<i64: 2, 64, 256>}]} {
    %c0 = arith.constant 0 : index
    %c0_0 = arith.constant 0 : index
    %c0_1 = arith.constant 0 : index
    %0 = vector.load %arg1[%c0, %c0_0, %c0_1] : memref<2x64x256xf32, #tpu.memory_space<vmem>>, vector<1x64x256xf32>
    %1 = vector.shape_cast %0 : vector<1x64x256xf32> to vector<64x256xf32>
    %cst = arith.constant dense<0.000000e+00> : vector<64xf32>
    %2 = vector.multi_reduction <add>, %1, %cst [1] : vector<64x256xf32> to vector<64xf32>
    %3 = vector.shape_cast %2 : vector<64xf32> to vector<64x1xf32>
    %cst_2 = arith.constant 3.906250e-03 : f32
    %4 = vector.broadcast %cst_2 : f32 to vector<64x1xf32>
    %5 = arith.mulf %3, %4 : vector<64x1xf32>
    %c0_3 = arith.constant 0 : index
    %c0_4 = arith.constant 0 : index
    %6 = vector.load %arg2[%c0_3, %c0_4] : memref<8x64xf32, #tpu.memory_space<vmem>>, vector<8x64xf32>
    %cst_5 = arith.constant dense<0.000000e+00> : vector<8x1xf32>
    %7 = tpu.matmul %6, %5, %cst_5 {dimension_numbers = #tpu.dot_dimension_numbers<[1], [0], [0], [1], [0, 0, 1, 1], [], []>} : vector<8x64xf32>, vector<64x1xf32>, vector<8x1xf32> -> vector<8x1xf32>
    %c0_6 = arith.constant 0 : index
    %c0_7 = arith.constant 0 : index
    %8 = vector.load %arg3[%c0_6, %c0_7] : memref<8x1xf32, #tpu.memory_space<vmem>>, vector<8x1xf32>
    %9 = arith.addf %7, %8 : vector<8x1xf32>
    %cst_8 = arith.constant 0.000000e+00 : f32
    %10 = vector.broadcast %cst_8 : f32 to vector<8x1xf32>
    %11 = arith.maximumf %9, %10 : vector<8x1xf32>
    %c0_9 = arith.constant 0 : index
    %c0_10 = arith.constant 0 : index
    %12 = vector.load %arg4[%c0_9, %c0_10] : memref<64x8xf32, #tpu.memory_space<vmem>>, vector<64x8xf32>
    %cst_11 = arith.constant dense<0.000000e+00> : vector<64x1xf32>
    %13 = tpu.matmul %12, %11, %cst_11 {dimension_numbers = #tpu.dot_dimension_numbers<[1], [0], [0], [1], [0, 0, 1, 1], [], []>} : vector<64x8xf32>, vector<8x1xf32>, vector<64x1xf32> -> vector<64x1xf32>
    %c0_12 = arith.constant 0 : index
    %c0_13 = arith.constant 0 : index
    %14 = vector.load %arg5[%c0_12, %c0_13] : memref<64x1xf32, #tpu.memory_space<vmem>>, vector<64x1xf32>
    %15 = arith.addf %13, %14 : vector<64x1xf32>
    %16 = arith.negf %15 : vector<64x1xf32>
    %17 = math.exp %16 : vector<64x1xf32>
    %cst_14 = arith.constant 1.000000e+00 : f32
    %18 = vector.broadcast %cst_14 : f32 to vector<64x1xf32>
    %19 = arith.addf %18, %17 : vector<64x1xf32>
    %20 = arith.divf %18, %19 : vector<64x1xf32>
    %21 = vector.broadcast %20 : vector<64x1xf32> to vector<64x256xf32>
    %22 = arith.mulf %1, %21 : vector<64x256xf32>
    %c0_15 = arith.constant 0 : index
    %c0_16 = arith.constant 0 : index
    %c0_17 = arith.constant 0 : index
    %23 = vector.load %arg6[%c0_15, %c0_16, %c0_17] : memref<2x64x256xf32, #tpu.memory_space<vmem>>, vector<1x64x256xf32>
    %24 = vector.shape_cast %23 : vector<1x64x256xf32> to vector<64x256xf32>
    %25 = vector.shape_cast %22 : vector<64x256xf32> to vector<1x64x256xf32>
    tpu.vector_store %arg6[%c0_15, %c0_16, %c0_17], %25 {strides = array<i32>} : memref<2x64x256xf32, #tpu.memory_space<vmem>>, vector<1x64x256xf32>,
    %c1 = arith.constant 1 : index
    %c0_18 = arith.constant 0 : index
    %c0_19 = arith.constant 0 : index
    %26 = vector.load %arg1[%c1, %c0_18, %c0_19] : memref<2x64x256xf32, #tpu.memory_space<vmem>>, vector<1x64x256xf32>
    %27 = vector.shape_cast %26 : vector<1x64x256xf32> to vector<64x256xf32>
    %cst_20 = arith.constant dense<0.000000e+00> : vector<64xf32>
    %28 = vector.multi_reduction <add>, %27, %cst_20 [1] : vector<64x256xf32> to vector<64xf32>
    %29 = vector.shape_cast %28 : vector<64xf32> to vector<64x1xf32>
    %cst_21 = arith.constant 3.906250e-03 : f32
    %30 = vector.broadcast %cst_21 : f32 to vector<64x1xf32>
    %31 = arith.mulf %29, %30 : vector<64x1xf32>
    %c0_22 = arith.constant 0 : index
    %c0_23 = arith.constant 0 : index
    %32 = vector.load %arg2[%c0_22, %c0_23] : memref<8x64xf32, #tpu.memory_space<vmem>>, vector<8x64xf32>
    %cst_24 = arith.constant dense<0.000000e+00> : vector<8x1xf32>
    %33 = tpu.matmul %32, %31, %cst_24 {dimension_numbers = #tpu.dot_dimension_numbers<[1], [0], [0], [1], [0, 0, 1, 1], [], []>} : vector<8x64xf32>, vector<64x1xf32>, vector<8x1xf32> -> vector<8x1xf32>
    %c0_25 = arith.constant 0 : index
    %c0_26 = arith.constant 0 : index
    %34 = vector.load %arg3[%c0_25, %c0_26] : memref<8x1xf32, #tpu.memory_space<vmem>>, vector<8x1xf32>
    %35 = arith.addf %33, %34 : vector<8x1xf32>
    %cst_27 = arith.constant 0.000000e+00 : f32
    %36 = vector.broadcast %cst_27 : f32 to vector<8x1xf32>
    %37 = arith.maximumf %35, %36 : vector<8x1xf32>
    %c0_28 = arith.constant 0 : index
    %c0_29 = arith.constant 0 : index
    %38 = vector.load %arg4[%c0_28, %c0_29] : memref<64x8xf32, #tpu.memory_space<vmem>>, vector<64x8xf32>
    %cst_30 = arith.constant dense<0.000000e+00> : vector<64x1xf32>
    %39 = tpu.matmul %38, %37, %cst_30 {dimension_numbers = #tpu.dot_dimension_numbers<[1], [0], [0], [1], [0, 0, 1, 1], [], []>} : vector<64x8xf32>, vector<8x1xf32>, vector<64x1xf32> -> vector<64x1xf32>
    %c0_31 = arith.constant 0 : index
    %c0_32 = arith.constant 0 : index
    %40 = vector.load %arg5[%c0_31, %c0_32] : memref<64x1xf32, #tpu.memory_space<vmem>>, vector<64x1xf32>
    %41 = arith.addf %39, %40 : vector<64x1xf32>
    %42 = arith.negf %41 : vector<64x1xf32>
    %43 = math.exp %42 : vector<64x1xf32>
    %cst_33 = arith.constant 1.000000e+00 : f32
    %44 = vector.broadcast %cst_33 : f32 to vector<64x1xf32>
    %45 = arith.addf %44, %43 : vector<64x1xf32>
    %46 = arith.divf %44, %45 : vector<64x1xf32>
    %47 = vector.broadcast %46 : vector<64x1xf32> to vector<64x256xf32>
    %48 = arith.mulf %27, %47 : vector<64x256xf32>
    %c1_34 = arith.constant 1 : index
    %c0_35 = arith.constant 0 : index
    %c0_36 = arith.constant 0 : index
    %49 = vector.load %arg6[%c1_34, %c0_35, %c0_36] : memref<2x64x256xf32, #tpu.memory_space<vmem>>, vector<1x64x256xf32>
    %50 = vector.shape_cast %49 : vector<1x64x256xf32> to vector<64x256xf32>
    %51 = vector.shape_cast %48 : vector<64x256xf32> to vector<1x64x256xf32>
    tpu.vector_store %arg6[%c1_34, %c0_35, %c0_36], %51 {strides = array<i32>} : memref<2x64x256xf32, #tpu.memory_space<vmem>>, vector<1x64x256xf32>,
    return
  }
  func.func @transform_0(%arg0: i32) -> (i32, i32, i32) {
    %c0_i32 = arith.constant 0 : i32
    %c0_i32_0 = arith.constant 0 : i32
    %c0_i32_1 = arith.constant 0 : i32
    return %arg0, %c0_i32, %c0_i32_0 : i32, i32, i32
  }
  func.func @transform_1(%arg0: i32) -> (i32, i32) {
    %c0_i32 = arith.constant 0 : i32
    %c0_i32_0 = arith.constant 0 : i32
    %c0_i32_1 = arith.constant 0 : i32
    return %c0_i32, %c0_i32_0 : i32, i32
  }
  func.func @transform_2(%arg0: i32) -> (i32, i32) {
    %c0_i32 = arith.constant 0 : i32
    %c0_i32_0 = arith.constant 0 : i32
    %c0_i32_1 = arith.constant 0 : i32
    return %c0_i32, %c0_i32_0 : i32, i32
  }
  func.func @transform_3(%arg0: i32) -> (i32, i32) {
    %c0_i32 = arith.constant 0 : i32
    %c0_i32_0 = arith.constant 0 : i32
    %c0_i32_1 = arith.constant 0 : i32
    return %c0_i32, %c0_i32_0 : i32, i32
  }
  func.func @transform_4(%arg0: i32) -> (i32, i32) {
    %c0_i32 = arith.constant 0 : i32
    %c0_i32_0 = arith.constant 0 : i32
    %c0_i32_1 = arith.constant 0 : i32
    return %c0_i32, %c0_i32_0 : i32, i32
  }
  func.func @transform_5(%arg0: i32) -> (i32, i32, i32) {
    %c0_i32 = arith.constant 0 : i32
    %c0_i32_0 = arith.constant 0 : i32
    %c0_i32_1 = arith.constant 0 : i32
    return %arg0, %c0_i32, %c0_i32_0 : i32, i32, i32
  }
}

</mosaic_0001>

<bundles_post_ra>
// kernel: tpu_custom_call.1
= control target key start
LH: loop header
LB: loop body
LE: loop exit
PB: predicated region body
PF: predicated region fallthrough
CT: control target
= control target key end

     0   :  { %10 = vsyncpa [#allocation3], 0  ;;  %s1458_s0 = inlined_call_operand.hbm [shape: f32[2,64,256], index: 0, kind: input, shape index: {}]   ;;  %s1459_s1 = inlined_call_operand.vmem [shape: f32[8,64], index: 1, kind: input, shape index: {}]   ;;  %s1460_s2 = inlined_call_operand.vmem [shape: f32[8,1], index: 2, kind: input, shape index: {}]   ;;  %s1461_s3 = inlined_call_operand.vmem [shape: f32[64,8], index: 3, kind: input, shape index: {}]   ;;  %s1462_s4 = inlined_call_operand.vmem [shape: f32[64,1], index: 4, kind: input, shape index: {}]   ;;  %s1463_s5 = inlined_call_operand.hbm [shape: f32[2,64,256], index: 5, kind: output, shape index: {}]  }
   0x1   :  { %11 = vsyncpa [#allocation4], 0  ;;  %s1118_s18 = smov [#allocation2]   ;;  %s1070_s22 = scalar_lea.hbm %s1458_s0, 4096 }
   0x2   :  { %s17_s19 = sshll.u32 %s1118_s18, 4  ;;  %p1071_p0 = scmp.ne.s32.totalorder %s1458_s0, %s1070_s22  ;;  %s18_s19 = int_to_ptr.vmem [resolvable:$true] %s17_s19 }
   0x3   :  { %p1074_p1 = scmp.lt.u32.totalorder %s1070_s22, %s1458_s0 }
   0x5   :  { %p1076_p2 = pnand %p1074_p1, %p1071_p0 }
   0x7   :  { %1079 = shalt.err (!%p1076_p2)
}
   0x8   :  { %s1080_s27 = scalar_lea.vmem %s18_s19, 4096  ;;  %p1085_p4 = scmp.lt.s32.totalorder %s18_s19, %s18_s19 }
   0x9   :  { %p1081_p3 = scmp.ne.s32.totalorder %s18_s19, %s1080_s27  ;;  %p1086_p5 = scmp.lt.s32.totalorder %s1080_s27, %s1080_s27 }
   0xb   :  { %p1087_p6 = por %p1086_p5, %p1085_p4 }
   0xd   :  { %p1088_p7 = pnand %p1087_p6, %p1081_p3 }
   0xf   :  { %1091 = shalt.err (!%p1088_p7)
}
  0x10   :  { %s1119_s28 = smov 256   ;;  %s1120_s29 = smov 16  }
  0x11   :  { %23 = dma.hbm_to_vmem [thread:$0]  %s1458_s0, 4096, %s18_s19, [#allocation3], %s1119_s28, %s1119_s28, %s1120_s29  }
  0x12   :  { %1114 = dma.done.wait [#allocation3], 4096  }
  0x13   :  { %1115 = vsyncadd [#allocation3], 4294963200  ;;  %v1171_v0 = vld [vmem:[#allocation2 + $0x20] sm:$0xff]  ;;  %v1173_v1 = vld [vmem:[#allocation2 + $0x28] sm:$0xff]  ;;  %v1121_v24 = vmov 0.0|0.0   ;;  %vm1122_vm0 = vmmov 0  }
  0x14   :  { %v1175_v2 = vld [vmem:[#allocation2] sm:$0xff]  ;;  %v57_v3 = vadd.f32 %v1173_v1, %v1171_v0  ;;  %v1179_v4 = vld [vmem:[#allocation2 + $0x8] sm:$0xff]  ;;  %v1181_v5 = vld [vmem:[#allocation2 + $0x30] sm:$0xff]  ;;  %970 = vmatprep.subr.bf16.mxu0 %v1121_v24  ;;  %v1123_v25 = vmov 0.0   ;;  %vm85_vm1 = vcmask 523264   ;;  %vm176_vm2 = vcmask 64512  }
  0x15   :  { %v1183_v6 = vld [vmem:[#allocation2 + $0x38] sm:$0xff]  ;;  %v51_v7 = vadd.f32 %v1179_v4, %v1175_v2  ;;  %v1187_v8 = vld [vmem:[#allocation2 + $0x10] sm:$0xff]  ;;  %v1199_v14 = vld [vmem:[#allocation2 + $0x40] sm:$0xff]  ;;  %920 = vmatprep.mubr.msk.f32.mxu0 %vm1122_vm0, %v1123_v25 }
  0x16   :  { %v1189_v9 = vld [vmem:[#allocation2 + $0x18] sm:$0xff]  ;;  %58 = vadd.xlane.f32.xlu1 %v57_v3  ;;  %v60_v10 = vadd.f32 %v1183_v6, %v1181_v5  ;;  %v1195_v12 = vld [vmem:[#allocation2 + $0x50] sm:$0xff]  ;;  %v1201_v15 = vld [vmem:[#allocation2 + $0x48] sm:$0xff] }
  0x17   :  { %52 = vadd.xlane.f32.xlu0 %v51_v7  ;;  %v54_v11 = vadd.f32 %v1189_v9, %v1187_v8  ;;  %v1197_v13 = vld [vmem:[#allocation2 + $0x58] sm:$0xff]  ;;  %v63_v17 = vadd.f32 %v1201_v15, %v1199_v14  ;;  %v1207_v18 = vld [vmem:[#allocation2 + $0x70] sm:$0xff]  ;;  %v1211_v20 = vld [vmem:[#allocation2 + $0x60] sm:$0xff] }
  0x18   :  { %v66_v16 = vadd.f32 %v1197_v13, %v1195_v12  ;;  %v1209_v19 = vld [vmem:[#allocation2 + $0x78] sm:$0xff]  ;;  %v1213_v21 = vld [vmem:[#allocation2 + $0x68] sm:$0xff]  ;;  %v1222_v26 = vld [vmem:[#allocation2 + $0x90] sm:$0xff] }
  0x19   :  { %v72_v22 = vadd.f32 %v1209_v19, %v1207_v18  ;;  %v69_v23 = vadd.f32 %v1213_v21, %v1211_v20  ;;  %v1224_v27 = vld [vmem:[#allocation2 + $0x98] sm:$0xff]  ;;  %v1226_v28 = vld [vmem:[#allocation2 + $0x80] sm:$0xff]  ;;  %v1230_v30 = vld [vmem:[#allocation2 + $0x88] sm:$0xff] }
  0x1a   :  { %61 = vadd.xlane.f32.xlu1 %v60_v10  ;;  %v446_v29 = vadd.f32 %v1224_v27, %v1222_v26  ;;  %v1232_v31 = vld [vmem:[#allocation2 + $0xb0] sm:$0xff]  ;;  %v1234_v32 = vld [vmem:[#allocation2 + $0xb8] sm:$0xff]  ;;  %v443_v33 = vadd.f32 %v1230_v30, %v1226_v28  ;;  %v1238_v34 = vld [vmem:[#allocation2 + $0xa0] sm:$0xff] }
  0x1b   :  { %55 = vadd.xlane.f32.xlu0 %v54_v11  ;;  %v1240_v35 = vld [vmem:[#allocation2 + $0xa8] sm:$0xff]  ;;  %v452_v36 = vadd.f32 %v1234_v32, %v1232_v31  ;;  %v1246_v38 = vld [vmem:[#allocation2 + $0xd0] sm:$0xff]  ;;  %v1248_v39 = vld [vmem:[#allocation2 + $0xd8] sm:$0xff] }
  0x1c   :  { %v449_v37 = vadd.f32 %v1240_v35, %v1238_v34  ;;  %v1250_v40 = vld [vmem:[#allocation2 + $0xc0] sm:$0xff]  ;;  %v1252_v41 = vld [vmem:[#allocation2 + $0xc8] sm:$0xff]  ;;  %v458_v42 = vadd.f32 %v1248_v39, %v1246_v38  ;;  %v1258_v44 = vld [vmem:[#allocation2 + $0xf0] sm:$0xff] }
  0x1d   :  { %v455_v43 = vadd.f32 %v1252_v41, %v1250_v40  ;;  %v1260_v45 = vld [vmem:[#allocation2 + $0xf8] sm:$0xff]  ;;  %v1262_v46 = vld [vmem:[#allocation2 + $0xe0] sm:$0xff]  ;;  %v1264_v47 = vld [vmem:[#allocation2 + $0xe8] sm:$0xff] }
  0x1e   :  { %67 = vadd.xlane.f32.xlu1 %v66_v16  ;;  %v464_v48 = vadd.f32 %v1260_v45, %v1258_v44  ;;  %v461_v49 = vadd.f32 %v1264_v47, %v1262_v46 }
  0x1f   :  { %64 = vadd.xlane.f32.xlu0 %v63_v17 }
  0x22   :  { %73 = vadd.xlane.f32.xlu1 %v72_v22  ;;  %v83_v22 = vld [vmem:[%s1459_s1] sm:$0xff] }
  0x23   :  { %70 = vadd.xlane.f32.xlu0 %v69_v23  ;;  %v160_v23 = vld [vmem:[%s1461_s3] sm:$0xff] }
  0x24   :  { %925 = vmatprep.mubr.msk.f32.mxu1 %vm176_vm2, %v160_v23 }
  0x26   :  { %447 = vadd.xlane.f32.xlu1 %v446_v29 }
  0x27   :  { %444 = vadd.xlane.f32.xlu0 %v443_v33 }
  0x2a   :  { %453 = vadd.xlane.f32.xlu1 %v452_v36 }
  0x2b   :  { %450 = vadd.xlane.f32.xlu0 %v449_v37 }
  0x2e   :  { %459 = vadd.xlane.f32.xlu1 %v458_v42  ;;  %v1285_v42 = vld [vmem:[%s1460_s2] sm:$0xff] }
  0x2f   :  { %456 = vadd.xlane.f32.xlu0 %v455_v43 }
  0x32   :  { %465 = vadd.xlane.f32.xlu1 %v464_v48 }
  0x33   :  { %462 = vadd.xlane.f32.xlu0 %v461_v49 }
  0xa3   :  { %v59_v50 = vpop.xlane.xlu1 %58 }
  0xa4   :  { %v53_v51 = vpop.xlane.xlu0 %52  ;;  %v77_v56 = vmul.f32 0.00390625, %v59_v50 }
  0xa5   :  { %v75_v54 = vmul.f32 0.00390625, %v53_v51 }
  0xa7   :  { %v62_v52 = vpop.xlane.xlu1 %61 }
  0xa8   :  { %v56_v53 = vpop.xlane.xlu0 %55  ;;  %v78_v57 = vmul.f32 0.00390625, %v62_v52 }
  0xa9   :  { %v76_v55 = vmul.f32 0.00390625, %v56_v53 }
  0xaa   :  { %v974_v63 = vpack.c.bf16 %v78_v57, %v77_v56  ;;  %v1291_v57 = vld [vmem:[%s1461_s3 + $0x8] sm:$0xff] }
  0xab   :  { %v971_v58 = vpack.c.bf16 %v76_v55, %v75_v54  ;;  %v68_v59 = vpop.xlane.xlu1 %67 }
  0xac   :  { %v65_v60 = vpop.xlane.xlu0 %64  ;;  %v80_v61 = vmul.f32 0.00390625, %v68_v59  ;;  %v1296_v59 = vld [vmem:[%s1461_s3 + $0x10] sm:$0xff] }
  0xad   :  { %972 = vmatpush3.bf16.msra.mxu0 %v971_v58  ;;  %v79_v62 = vmul.f32 0.00390625, %v65_v60 }
  0xae   :  { %973 = vmatprep.subr.bf16.mxu0 %v1121_v24 }
  0xaf   :  { %v74_v3 = vpop.xlane.xlu1 %73  ;;  %v977_v10 = vpack.c.bf16 %v80_v61, %v79_v62  ;;  %v1306_v62 = vld [vmem:[%s1461_s3 + $0x18] sm:$0xff] }
  0xb0   :  { %v71_v7 = vpop.xlane.xlu0 %70  ;;  %v82_v11 = vmul.f32 0.00390625, %v74_v3  ;;  %v1312_v3 = vld [vmem:[%s1461_s3 + $0x20] sm:$0xff] }
  0xb1   :  { %975 = vmatpush3.bf16.msra.mxu0 %v974_v63  ;;  %v81_v16 = vmul.f32 0.00390625, %v71_v7 }
  0xb2   :  { %976 = vmatprep.subr.bf16.mxu0 %v1121_v24 }
  0xb3   :  { %v980_v17 = vpack.c.bf16 %v82_v11, %v81_v16  ;;  %v448_v29 = vpop.xlane.xlu1 %447 }
  0xb4   :  { %v445_v33 = vpop.xlane.xlu0 %444  ;;  %v468_v48 = vmul.f32 0.00390625, %v448_v29  ;;  %v166_v29 = vld [vmem:[%s1461_s3 + $0x30] sm:$0xff] }
  0xb5   :  { %978 = vmatpush3.bf16.msra.mxu0 %v977_v10  ;;  %v467_v49 = vmul.f32 0.00390625, %v445_v33 }
  0xb6   :  { %979 = vmatprep.subr.bf16.mxu0 %v1121_v24 }
  0xb7   :  { %v454_v36 = vpop.xlane.xlu1 %453  ;;  %v983_v55 = vpack.c.bf16 %v468_v48, %v467_v49 }
  0xb8   :  { %v451_v37 = vpop.xlane.xlu0 %450  ;;  %v470_v56 = vmul.f32 0.00390625, %v454_v36  ;;  %v1333_v36 = vld [vmem:[%s1461_s3 + $0x38] sm:$0xff] }
  0xb9   :  { %981 = vmatpush3.bf16.msra.mxu0 %v980_v17  ;;  %v469_v58 = vmul.f32 0.00390625, %v451_v37  ;;  %v1321_v17 = vld [vmem:[%s1461_s3 + $0x28] sm:$0xff]  ;;  %v1124_v37 = vmov 0  }
  0xba   :  { %1004 = vset.pattern.permute.xlu1 %v1124_v37  ;;  %1005 = vset.pattern.permute.xlu0 %v1124_v37 }
  0xbb   :  { %v460_v53 = vpop.xlane.xlu1 %459  ;;  %v986_v60 = vpack.c.bf16 %v470_v56, %v469_v58 }
  0xbc   :  { %921 = vmatmul.mubr.msk.f32.vlgmr.msra.gmra.mrb[0].mxu0 %vm85_vm1, %v83_v22  ;;  %v457_v54 = vpop.xlane.xlu0 %456  ;;  %v472_v61 = vmul.f32 0.00390625, %v460_v53 }
  0xbd   :  { %958 = vmatprep.mubr.msk.f32.mxu0 %vm176_vm2, %v160_v23  ;;  %v471_v63 = vmul.f32 0.00390625, %v457_v54 }
  0xbf   :  { %v466_v7 = vpop.xlane.xlu1 %465  ;;  %v989_v11 = vpack.c.bf16 %v472_v61, %v471_v63  ;;  %v1374_v63 = vld [vmem:[%s1462_s4 + $0x20] sm:$0xff] }
  0xc0   :  { %v463_v10 = vpop.xlane.xlu0 %462  ;;  %v474_v16 = vmul.f32 0.00390625, %v466_v7 }
  0xc1   :  { %v473_v23 = vmul.f32 0.00390625, %v463_v10 }
  0xc3   :  { %v992_v33 = vpack.c.bf16 %v474_v16, %v473_v23 }
 0x18f   :  { %v155_v43 = vpop.f32.mrb[0].mxu0 }
 0x190   :  { %v156_v50 = vadd.f32 %v155_v43, %v1285_v42  ;;  %v922_v51 = vpop.f32.mrb[1].mxu0  ;;  %v1345_v43 = vld [vmem:[%s1462_s4 + $0x8] sm:$0xff] }
 0x192   :  { %v159_v52 = vmax.f32 %v156_v50, 0.0  ;;  %v1357_v50 = vld [vmem:[%s1462_s4 + $0x18] sm:$0xff] }
 0x194   :  { %923 = vmatprep.subr.mxu1 %v159_v52 }
 0x195   :  { %924 = vmatpush3.msra.mxu1 %v159_v52  ;;  %v1362_v52 = vld [vmem:[%s1462_s4 + $0x10] sm:$0xff] }
 0x196   :  { %926 = vmatmul.mubr.msk.f32.vlgmr.msra.gmra.mrb[0].mxu1 %vm176_vm2, %v1291_v57  ;;  %982 = vmatprep.subr.bf16.mxu1 %v1121_v24 }
 0x197   :  { %984 = vmatpush3.bf16.msra.mxu1 %v983_v55  ;;  %928 = vmatprep.mubr.msk.f32.mxu1 %vm176_vm2, %v1296_v59 }
 0x198   :  { %985 = vmatprep.subr.bf16.mxu1 %v1121_v24 }
 0x19a   :  { %929 = vmatmul.mubr.msk.f32.gmra.mrb[2].mxu1 %vm176_vm2, %v1306_v62 }
 0x19b   :  { %987 = vmatpush3.bf16.msra.mxu1 %v986_v60  ;;  %931 = vmatprep.mubr.msk.f32.mxu1 %vm176_vm2, %v1312_v3  ;;  %v1369_v60 = vld [vmem:[%s1462_s4 + $0x28] sm:$0xff] }
 0x19c   :  { %988 = vmatprep.subr.bf16.mxu1 %v1121_v24 }
 0x19e   :  { %932 = vmatmul.mubr.msk.f32.gmra.mrb[4].mxu1 %vm176_vm2, %v1321_v17 }
 0x19f   :  { %990 = vmatpush3.bf16.msra.mxu1 %v989_v11  ;;  %934 = vmatprep.mubr.msk.f32.mxu1 %vm176_vm2, %v166_v29 }
 0x1a0   :  { %991 = vmatprep.subr.bf16.mxu1 %v1121_v24  ;;  %v1350_v24 = vld [vmem:[%s1462_s4] sm:$0xff] }
 0x1a2   :  { %935 = vmatmul.mubr.msk.f32.gmra.mrb[6].mxu1 %vm176_vm2, %v1333_v36 }
 0x1a3   :  { %993 = vmatpush3.bf16.msra.mxu1 %v992_v33  ;;  %953 = vmatprep.mubr.msk.f32.mxu1 %vm1122_vm0, %v1123_v25 }
 0x1a6   :  { %954 = vmatmul.mubr.msk.f32.vlgmr.msra.gmra.mrb[8].mxu1 %vm85_vm1, %v83_v22 }
 0x1a7   :  { %967 = vmatprep.mubr.msk.f32.mxu1 %vm176_vm2, %v166_v29  ;;  %v1381_v29 = vld [vmem:[%s1462_s4 + $0x38] sm:$0xff] }
 0x269   :  { %v927_v48 = vpop.f32.mrb[0].mxu1 }
 0x26a   :  { %v273_v25 = vadd.f32 %v927_v48, %v1345_v43  ;;  %v267_v49 = vpop.f32.mrb[1].mxu1 }
 0x26b   :  { %v268_v22 = vadd.f32 %v267_v49, %v1350_v24 }
 0x26c   :  { %v844_v51 = vmul.f32 -1.442695, %v273_v25 }
 0x26d   :  { %v843_v53 = vmul.f32 -1.442695, %v268_v22  ;;  %v930_v54 = vpop.f32.mrb[2].mxu1  ;;  %v1387_v22 = vld [vmem:[%s1462_s4 + $0x30] sm:$0xff]  ;;  %s1125_s4 = smov [#allocation5]  }
 0x26e   :  { %1006 = vpow2.f32 %v844_v51  ;;  %v283_v55 = vadd.f32 %v930_v54, %v1357_v50  ;;  %v277_v56 = vpop.f32.mrb[3].mxu1  ;;  %s822_s13 = sshll.u32 %s1125_s4, 4  ;;  %s823_s13 = int_to_ptr.vmem [resolvable:$true] %s822_s13 }
 0x26f   :  { %1008 = vpow2.f32 %v843_v53  ;;  %v278_v58 = vadd.f32 %v277_v56, %v1362_v52  ;;  %s1092_s14 = scalar_lea.vmem %s823_s13, 4096  ;;  %p1097_p9 = scmp.lt.s32.totalorder %s823_s13, %s823_s13 }
 0x270   :  { %v846_v61 = vmul.f32 -1.442695, %v283_v55  ;;  %p1093_p8 = scmp.ne.s32.totalorder %s823_s13, %s1092_s14  ;;  %p1098_p10 = scmp.lt.s32.totalorder %s1092_s14, %s1092_s14 }
 0x271   :  { %v845_v7 = vmul.f32 -1.442695, %v278_v58  ;;  %v933_v10 = vpop.f32.mrb[4].mxu1 }
 0x272   :  { %1010 = vpow2.f32 %v846_v61  ;;  %v293_v11 = vadd.f32 %v933_v10, %v1369_v60  ;;  %v287_v16 = vpop.f32.mrb[5].mxu1  ;;  %p1099_p11 = por %p1098_p10, %p1097_p9 }
 0x273   :  { %1012 = vpow2.f32 %v845_v7  ;;  %v288_v23 = vadd.f32 %v287_v16, %v1374_v63 }
 0x274   :  { %v848_v33 = vmul.f32 -1.442695, %v293_v11  ;;  %p1100_p12 = pnand %p1099_p11, %p1093_p8 }
 0x275   :  { %v847_v37 = vmul.f32 -1.442695, %v288_v23  ;;  %v936_v48 = vpop.f32.mrb[6].mxu1 }
 0x276   :  { %1014 = vpow2.f32 %v848_v33  ;;  %v303_v25 = vadd.f32 %v936_v48, %v1381_v29  ;;  %v297_v49 = vpop.f32.mrb[7].mxu1 }
 0x277   :  { %1016 = vpow2.f32 %v847_v37  ;;  %v298_v61 = vadd.f32 %v297_v49, %v1387_v22 }
 0x278   :  { %v1007_v51 = vpop.eup %1006  ;;  %v850_v58 = vmul.f32 -1.442695, %v303_v25 }
 0x279   :  { %v1009_v53 = vpop.eup %1008  ;;  %v331_v54 = vadd.f32 1.0, %v1007_v51  ;;  %v546_v55 = vpop.f32.mrb[8].mxu1  ;;  %v849_v48 = vmul.f32 -1.442695, %v298_v61 }
 0x27a   :  { %v330_v56 = vadd.f32 1.0, %v1009_v53  ;;  %v547_v7 = vadd.f32 %v546_v55, %v1285_v42  ;;  %v955_v10 = vpop.f32.mrb[9].mxu1 }
 0x27b   :  { %1018 = vrcp.f32 %v331_v54 }
 0x27c   :  { %v1011_v11 = vpop.eup %1010  ;;  %1020 = vrcp.f32 %v330_v56  ;;  %v550_v16 = vmax.f32 %v547_v7, 0.0 }
 0x27d   :  { %v1013_v23 = vpop.eup %1012  ;;  %v333_v33 = vadd.f32 1.0, %v1011_v11  ;;  %1022 = vpow2.f32 %v850_v58 }
 0x27e   :  { %956 = vmatprep.subr.mxu0 %v550_v16  ;;  %994 = vmatprep.subr.mxu1 %v550_v16  ;;  %v332_v37 = vadd.f32 1.0, %v1013_v23 }
 0x27f   :  { %1024 = vrcp.f32 %v333_v33  ;;  %957 = vmatpush3.msra.mxu0 %v550_v16  ;;  %995 = vmatpush3.msra.mxu1 %v550_v16 }
 0x280   :  { %v1015_v25 = vpop.eup %1014  ;;  %959 = vmatmul.mubr.msk.f32.vlgmr.msra.gmra.mrb[2].mxu0 %vm176_vm2, %v1291_v57  ;;  %968 = vmatmul.mubr.msk.f32.vlgmr.msra.gmra.mrb[10].mxu1 %vm176_vm2, %v1333_v36  ;;  %1026 = vpow2.f32 %v849_v48 }
 0x281   :  { %961 = vmatprep.mubr.msk.f32.mxu0 %vm176_vm2, %v1296_v59  ;;  %v1017_v42 = vpop.eup %1016  ;;  %1028 = vrcp.f32 %v332_v37  ;;  %v335_v49 = vadd.f32 1.0, %v1015_v25 }
 0x282   :  { %v334_v57 = vadd.f32 1.0, %v1017_v42 }
 0x283   :  { %1030 = vrcp.f32 %v335_v49 }
 0x284   :  { %962 = vmatmul.mubr.msk.f32.gmra.mrb[4].mxu0 %vm176_vm2, %v1306_v62  ;;  %1032 = vrcp.f32 %v334_v57 }
 0x285   :  { %v1019_v51 = vpop.eup %1018  ;;  %964 = vmatprep.mubr.msk.f32.mxu0 %vm176_vm2, %v1312_v3 }
 0x286   :  { %v1021_v53 = vpop.eup %1020  ;;  %361 = vperm.xlu1 %1004, %v1019_v51  }
 0x287   :  { %356 = vperm.xlu0 %1005, %v1021_v53   ;;  %v1023_v36 = vpop.eup %1022 }
 0x288   :  { %965 = vmatmul.mubr.msk.f32.gmra.mrb[6].mxu0 %vm176_vm2, %v1321_v17  ;;  %v337_v54 = vadd.f32 1.0, %v1023_v36 }
 0x289   :  { %v1025_v59 = vpop.eup %1024 }
 0x28a   :  { %371 = vperm.xlu1 %1004, %v1025_v59   ;;  %v1027_v55 = vpop.eup %1026  ;;  %1034 = vrcp.f32 %v337_v54 }
 0x28b   :  { %v1029_v56 = vpop.eup %1028  ;;  %v336_v62 = vadd.f32 1.0, %v1027_v55 }
 0x28d   :  { %v1031_v58 = vpop.eup %1030  ;;  %1036 = vrcp.f32 %v336_v62 }
 0x28e   :  { %366 = vperm.xlu1 %1004, %v1029_v56   ;;  %v1033_v3 = vpop.eup %1032 }
 0x292   :  { %381 = vperm.xlu1 %1004, %v1031_v58  }
 0x294   :  { %v1035_v61 = vpop.eup %1034 }
 0x296   :  { %376 = vperm.xlu1 %1004, %v1033_v3  }
 0x297   :  { %v1037_v7 = vpop.eup %1036 }
 0x29a   :  { %391 = vperm.xlu1 %1004, %v1035_v61  }
 0x29e   :  { %386 = vperm.xlu1 %1004, %v1037_v7  }
 0x305   :  { %v362_v10 = vpop.permute.xlu1 %361 }
 0x306   :  { %v396_v17 = vmul.f32 %v362_v10, %v1187_v8  ;;  %v397_v11 = vmul.f32 %v362_v10, %v1189_v9  ;;  %v357_v16 = vpop.permute.xlu0 %356 }
 0x307   :  { %v394_v23 = vmul.f32 %v357_v16, %v1175_v2  ;;  %v395_v33 = vmul.f32 %v357_v16, %v1179_v4 }
 0x308   :  { %412 = vst [vmem:[#allocation5 + $0x10] sm:$0xff] %v396_v17  ;;  %413 = vst [vmem:[#allocation5 + $0x18] sm:$0xff] %v397_v11 }
 0x309   :  { %410 = vst [vmem:[#allocation5] sm:$0xff] %v394_v23  ;;  %411 = vst [vmem:[#allocation5 + $0x8] sm:$0xff] %v395_v33  ;;  %v372_v48 = vpop.permute.xlu1 %371 }
 0x30a   :  { %v400_v37 = vmul.f32 %v372_v48, %v1181_v5  ;;  %v401_v25 = vmul.f32 %v372_v48, %v1183_v6 }
 0x30c   :  { %416 = vst [vmem:[#allocation5 + $0x30] sm:$0xff] %v400_v37  ;;  %417 = vst [vmem:[#allocation5 + $0x38] sm:$0xff] %v401_v25 }
 0x30d   :  { %v367_v42 = vpop.permute.xlu1 %366 }
 0x30e   :  { %v398_v8 = vmul.f32 %v367_v42, %v1171_v0  ;;  %v399_v9 = vmul.f32 %v367_v42, %v1173_v1 }
 0x310   :  { %414 = vst [vmem:[#allocation5 + $0x20] sm:$0xff] %v398_v8  ;;  %415 = vst [vmem:[#allocation5 + $0x28] sm:$0xff] %v399_v9 }
 0x311   :  { %v382_v2 = vpop.permute.xlu1 %381 }
 0x312   :  { %v404_v4 = vmul.f32 %v382_v2, %v1195_v12  ;;  %v405_v49 = vmul.f32 %v382_v2, %v1197_v13 }
 0x314   :  { %420 = vst [vmem:[#allocation5 + $0x50] sm:$0xff] %v404_v4  ;;  %421 = vst [vmem:[#allocation5 + $0x58] sm:$0xff] %v405_v49 }
 0x315   :  { %v377_v51 = vpop.permute.xlu1 %376 }
 0x316   :  { %v402_v5 = vmul.f32 %v377_v51, %v1199_v14  ;;  %v403_v6 = vmul.f32 %v377_v51, %v1201_v15 }
 0x318   :  { %418 = vst [vmem:[#allocation5 + $0x40] sm:$0xff] %v402_v5  ;;  %419 = vst [vmem:[#allocation5 + $0x48] sm:$0xff] %v403_v6 }
 0x319   :  { %v392_v53 = vpop.permute.xlu1 %391 }
 0x31a   :  { %v408_v0 = vmul.f32 %v392_v53, %v1207_v18  ;;  %v409_v1 = vmul.f32 %v392_v53, %v1209_v19 }
 0x31c   :  { %424 = vst [vmem:[#allocation5 + $0x70] sm:$0xff] %v408_v0  ;;  %425 = vst [vmem:[#allocation5 + $0x78] sm:$0xff] %v409_v1 }
 0x31d   :  { %v387_v57 = vpop.permute.xlu1 %386 }
 0x31e   :  { %v406_v12 = vmul.f32 %v387_v57, %v1211_v20  ;;  %v407_v13 = vmul.f32 %v387_v57, %v1213_v21 }
 0x320   :  { %422 = vst [vmem:[#allocation5 + $0x60] sm:$0xff] %v406_v12  ;;  %423 = vst [vmem:[#allocation5 + $0x68] sm:$0xff] %v407_v13 }
 0x353   :  { %v960_v36 = vpop.f32.mrb[2].mxu0  ;;  %v969_v14 = vpop.f32.mrb[10].mxu1 }
 0x354   :  { %v663_v15 = vadd.f32 %v960_v36, %v1345_v43  ;;  %v657_v59 = vpop.f32.mrb[3].mxu0  ;;  %v687_v54 = vpop.f32.mrb[11].mxu1  ;;  %v693_v19 = vadd.f32 %v969_v14, %v1381_v29 }
 0x355   :  { %v658_v55 = vadd.f32 %v657_v59, %v1350_v24  ;;  %v688_v58 = vadd.f32 %v687_v54, %v1387_v22 }
 0x356   :  { %v861_v18 = vmul.f32 -1.442695, %v663_v15  ;;  %v867_v43 = vmul.f32 -1.442695, %v693_v19 }
 0x357   :  { %v860_v56 = vmul.f32 -1.442695, %v658_v55  ;;  %v963_v62 = vpop.f32.mrb[4].mxu0  ;;  %v866_v17 = vmul.f32 -1.442695, %v688_v58 }
 0x358   :  { %1038 = vpow2.f32 %v861_v18  ;;  %v673_v20 = vadd.f32 %v963_v62, %v1357_v50  ;;  %v667_v21 = vpop.f32.mrb[5].mxu0 }
 0x359   :  { %1040 = vpow2.f32 %v860_v56  ;;  %v668_v3 = vadd.f32 %v667_v21, %v1362_v52 }
 0x35a   :  { %v863_v61 = vmul.f32 -1.442695, %v673_v20 }
 0x35b   :  { %v862_v7 = vmul.f32 -1.442695, %v668_v3  ;;  %v966_v10 = vpop.f32.mrb[6].mxu0 }
 0x35c   :  { %1042 = vpow2.f32 %v863_v61  ;;  %v683_v24 = vadd.f32 %v966_v10, %v1369_v60  ;;  %v677_v29 = vpop.f32.mrb[7].mxu0 }
 0x35d   :  { %1044 = vpow2.f32 %v862_v7  ;;  %v678_v11 = vadd.f32 %v677_v29, %v1374_v63 }
 0x35e   :  { %v865_v22 = vmul.f32 -1.442695, %v683_v24  ;;  %1046 = vpow2.f32 %v867_v43 }
 0x35f   :  { %v864_v16 = vmul.f32 -1.442695, %v678_v11  ;;  %1048 = vpow2.f32 %v866_v17 }
 0x360   :  { %1050 = vpow2.f32 %v865_v22 }
 0x361   :  { %1052 = vpow2.f32 %v864_v16 }
 0x362   :  { %v1039_v50 = vpop.eup %1038 }
 0x363   :  { %v1041_v52 = vpop.eup %1040  ;;  %v721_v23 = vadd.f32 1.0, %v1039_v50 }
 0x364   :  { %v720_v33 = vadd.f32 1.0, %v1041_v52 }
 0x365   :  { %1054 = vrcp.f32 %v721_v23 }
 0x366   :  { %v1043_v48 = vpop.eup %1042  ;;  %1056 = vrcp.f32 %v720_v33 }
 0x367   :  { %v1045_v37 = vpop.eup %1044  ;;  %v723_v25 = vadd.f32 1.0, %v1043_v48 }
 0x368   :  { %v1047_v60 = vpop.eup %1046  ;;  %v722_v42 = vadd.f32 1.0, %v1045_v37 }
 0x369   :  { %v1049_v8 = vpop.eup %1048  ;;  %1058 = vrcp.f32 %v723_v25  ;;  %v727_v4 = vadd.f32 1.0, %v1047_v60 }
 0x36a   :  { %v1051_v63 = vpop.eup %1050  ;;  %1060 = vrcp.f32 %v722_v42  ;;  %v726_v51 = vadd.f32 1.0, %v1049_v8 }
 0x36b   :  { %v1053_v9 = vpop.eup %1052  ;;  %v725_v2 = vadd.f32 1.0, %v1051_v63 }
 0x36c   :  { %v724_v49 = vadd.f32 1.0, %v1053_v9 }
 0x36d   :  { %1062 = vrcp.f32 %v725_v2 }
 0x36e   :  { %1064 = vrcp.f32 %v724_v49 }
 0x36f   :  { %v1055_v5 = vpop.eup %1054  ;;  %1066 = vrcp.f32 %v727_v4 }
 0x370   :  { %v1057_v6 = vpop.eup %1056  ;;  %1068 = vrcp.f32 %v726_v51  ;;  %751 = vperm.xlu0 %1005, %v1055_v5  }
 0x371   :  { %746 = vperm.xlu1 %1004, %v1057_v6  }
 0x373   :  { %v1059_v53 = vpop.eup %1058 }
 0x374   :  { %v1061_v0 = vpop.eup %1060  ;;  %761 = vperm.xlu0 %1005, %v1059_v53  }
 0x375   :  { %756 = vperm.xlu1 %1004, %v1061_v0  }
 0x377   :  { %v1063_v1 = vpop.eup %1062 }
 0x378   :  { %v1065_v57 = vpop.eup %1064  ;;  %771 = vperm.xlu0 %1005, %v1063_v1  }
 0x379   :  { %v1067_v12 = vpop.eup %1066  ;;  %766 = vperm.xlu1 %1004, %v1065_v57  }
 0x37a   :  { %v1069_v13 = vpop.eup %1068 }
 0x37c   :  { %781 = vperm.xlu0 %1005, %v1067_v12  }
 0x37d   :  { %776 = vperm.xlu1 %1004, %v1069_v13  }
 0x3ef   :  { %v752_v36 = vpop.permute.xlu0 %751 }
 0x3f0   :  { %v786_v14 = vmul.f32 %v752_v36, %v1222_v26  ;;  %v787_v15 = vmul.f32 %v752_v36, %v1224_v27  ;;  %v747_v59 = vpop.permute.xlu1 %746 }
 0x3f1   :  { %v784_v54 = vmul.f32 %v747_v59, %v1226_v28  ;;  %v785_v55 = vmul.f32 %v747_v59, %v1230_v30 }
 0x3f2   :  { %803 = vst [vmem:[#allocation5 + $0x90] sm:$0xff] %v786_v14  ;;  %804 = vst [vmem:[#allocation5 + $0x98] sm:$0xff] %v787_v15 }
 0x3f3   :  { %801 = vst [vmem:[#allocation5 + $0x80] sm:$0xff] %v784_v54  ;;  %802 = vst [vmem:[#allocation5 + $0x88] sm:$0xff] %v785_v55  ;;  %v762_v18 = vpop.permute.xlu0 %761 }
 0x3f4   :  { %v790_v19 = vmul.f32 %v762_v18, %v1232_v31  ;;  %v791_v56 = vmul.f32 %v762_v18, %v1234_v32  ;;  %v757_v62 = vpop.permute.xlu1 %756 }
 0x3f5   :  { %v788_v58 = vmul.f32 %v757_v62, %v1238_v34  ;;  %v789_v26 = vmul.f32 %v757_v62, %v1240_v35 }
 0x3f6   :  { %807 = vst [vmem:[#allocation5 + $0xb0] sm:$0xff] %v790_v19  ;;  %808 = vst [vmem:[#allocation5 + $0xb8] sm:$0xff] %v791_v56 }
 0x3f7   :  { %805 = vst [vmem:[#allocation5 + $0xa0] sm:$0xff] %v788_v58  ;;  %806 = vst [vmem:[#allocation5 + $0xa8] sm:$0xff] %v789_v26  ;;  %v772_v27 = vpop.permute.xlu0 %771 }
 0x3f8   :  { %v794_v28 = vmul.f32 %v772_v27, %v1246_v38  ;;  %v795_v30 = vmul.f32 %v772_v27, %v1248_v39  ;;  %v767_v20 = vpop.permute.xlu1 %766 }
 0x3f9   :  { %v792_v21 = vmul.f32 %v767_v20, %v1250_v40  ;;  %v793_v31 = vmul.f32 %v767_v20, %v1252_v41 }
 0x3fa   :  { %811 = vst [vmem:[#allocation5 + $0xd0] sm:$0xff] %v794_v28  ;;  %812 = vst [vmem:[#allocation5 + $0xd8] sm:$0xff] %v795_v30 }
 0x3fb   :  { %809 = vst [vmem:[#allocation5 + $0xc0] sm:$0xff] %v792_v21  ;;  %810 = vst [vmem:[#allocation5 + $0xc8] sm:$0xff] %v793_v31  ;;  %v782_v32 = vpop.permute.xlu0 %781 }
 0x3fc   :  { %v798_v34 = vmul.f32 %v782_v32, %v1258_v44  ;;  %v799_v35 = vmul.f32 %v782_v32, %v1260_v45  ;;  %v777_v3 = vpop.permute.xlu1 %776 }
 0x3fd   :  { %v796_v38 = vmul.f32 %v777_v3, %v1262_v46  ;;  %v797_v39 = vmul.f32 %v777_v3, %v1264_v47 }
 0x3fe   :  { %815 = vst [vmem:[#allocation5 + $0xf0] sm:$0xff] %v798_v34  ;;  %816 = vst [vmem:[#allocation5 + $0xf8] sm:$0xff] %v799_v35 }
 0x3ff   :  { %813 = vst [vmem:[#allocation5 + $0xe0] sm:$0xff] %v796_v38  ;;  %814 = vst [vmem:[#allocation5 + $0xe8] sm:$0xff] %v797_v39 }
 0x400   :  { %1103 = shalt.err (!%p1100_p12)
}
 0x401   :  { %s1104_s17 = scalar_lea.hbm %s1463_s5, 4096 }
 0x402   :  { %p1105_p13 = scmp.ne.s32.totalorder %s1463_s5, %s1104_s17  ;;  %p1108_p0 = scmp.lt.u32.totalorder %s1104_s17, %s1463_s5 }
 0x404   :  { %p1110_p1 = pnand %p1108_p0, %p1105_p13 }
 0x406   :  { %1113 = shalt.err (!%p1110_p1)
}
 0x407   :  { %828 = dma.vmem_to_hbm [thread:$0]  %s823_s13, 4096, %s1463_s5, [#allocation4], %s1119_s28, %s1119_s28, %s1120_s29  }
 0x408   :  { %1116 = dma.done.wait [#allocation4], 4096  }
 0x409   :  { %1117 = vsyncadd [#allocation4], 4294963200 }
 0x40a   :  { %832 = vsyncpa [#allocation3], 1 }
 0x40b   :  { %833 = vsyncpa [#allocation4], 1 }

</bundles_post_ra>
